<compile_context>
chip_gen: v7x
topology: tpu7x:2x2x1
jax: 0.10.0
libtpu: 0.0.40
codegen_flags: <defaults>
</compile_context>

<pallas_src>
import jax
import jax.numpy as jnp
from jax import lax
from jax.experimental import pallas as pl
from jax.experimental.pallas import tpu as pltpu

INPUT_SIZE = 36
HIDDEN_SIZE = 72
NUM_CLASSES = 3

_CLASSES_PAD = 8      # NUM_CLASSES padded to one sublane group for the matmul
_LANE = 128
_SUBLANE = 8


def mlp_kernel(x_ref, w1_ref, b1_ref, w2t_ref, b2t_ref, ot_ref):
    # x tile: (TM, 36), f32 (or bf16 if the producer already hands bf16 over).
    x = x_ref[...]
    if x.dtype != jnp.bfloat16:
        x = x.astype(jnp.bfloat16)

    # fc1 on the MXU (bf16 operands, f32 accumulation), bias + ReLU on the VPU.
    h = jnp.dot(x, w1_ref[...], preferred_element_type=jnp.float32)   # (TM, 72)
    h = jnp.maximum(h + b1_ref[...], 0.0).astype(jnp.bfloat16)

    # fc2 emitted lane-dense / transposed: (8, TM) = w2t (8, 72) . h^T using the
    # NT dot_general form (both operands contracted on their last dim), the same
    # pattern as the production flash-attention q.k^T -- the MXU does the
    # transposed stationary push natively, no XLU transpose of h.
    ot = lax.dot_general(
        w2t_ref[...], h,
        dimension_numbers=(((1,), (1,)), ((), ())),
        preferred_element_type=jnp.float32)                           # (8, TM)

    ot_ref[...] = (ot[:NUM_CLASSES, :] + b2t_ref[...]).astype(ot_ref.dtype)


def _round_up(n, m):
    return ((n + m - 1) // m) * m


def net_forward(x, w1, b1, w2, b2, *, block_rows=8192, transposed_output=False):
    """Forward pass of Net (fc1 -> ReLU -> fc2).

    x : (B, 36) float32 (or bfloat16)
    w1: (36, 72), b1: (1, 72), w2: (72, 3), b2: (1, 3)   (float32)
    Returns (B, 3) float32, or (3, B) float32 if transposed_output=True.
    """
    B = x.shape[0]
    assert x.shape[1] == INPUT_SIZE

    # Hoisted parameter prep (tiny arrays, done once per call in the wrapper):
    # bf16 weights so the VMEM-resident copies are MXU-ready; w2 transposed and
    # padded to a full sublane group; b2 as a (3, 1) column for the transposed
    # output orientation.
    w1_k = w1.astype(jnp.bfloat16)                                     # (36, 72)
    b1_k = b1.reshape(1, HIDDEN_SIZE).astype(jnp.float32)              # (1, 72)
    w2t_k = jnp.pad(w2.T.astype(jnp.bfloat16),
                    ((0, _CLASSES_PAD - NUM_CLASSES), (0, 0)))         # (8, 72)
    b2t_k = b2.reshape(NUM_CLASSES, 1).astype(jnp.float32)             # (3, 1)

    # ---- batch tiling -------------------------------------------------------
    if B <= _LANE:
        # Single block.  Round the handful of rows up to a sublane multiple so
        # the in-kernel matmul M is aligned (pads at most 7 tiny rows).
        bk = _round_up(max(B, 1), _SUBLANE)
        x_k = jnp.pad(x, ((0, bk - B), (0, 0))) if bk != B else x
        tm, grid_b = bk, 1
    else:
        # Tiled batch.  tm is a multiple of 128 (the transposed output puts the
        # batch on the lane axis) and is chosen so there are >= 2 grid steps
        # (v7x dual-TC sharding).  The last block may be partial; Pallas masks
        # its DMA and store -- no jnp.pad of x (no extra HBM pass).
        bk = B
        tm = min(_round_up(block_rows, _LANE), _round_up((B + 1) // 2, _LANE))
        grid_b = pl.cdiv(B, tm)
        x_k = x

    # VMEM budget scales with the row tile: ~1 KiB/row of double-buffered x
    # plus compute intermediates; 32 MiB covers tm=8192 (v7x-safe), larger
    # block_rows (v5e/v6e only) raises the limit accordingly.
    vmem_limit = int(min(128 * 1024 * 1024, max(32 * 1024 * 1024, 4 * 1024 * tm)))

    flops = 2 * B * (INPUT_SIZE * HIDDEN_SIZE + HIDDEN_SIZE * NUM_CLASSES)
    bytes_accessed = (
        bk * INPUT_SIZE * x.dtype.itemsize            # x read (dominant)
        + bk * NUM_CLASSES * 4                        # output write
        + (INPUT_SIZE + _CLASSES_PAD) * HIDDEN_SIZE * 2
        + (HIDDEN_SIZE + NUM_CLASSES) * 4)            # resident params

    out_t = pl.pallas_call(
        mlp_kernel,
        out_shape=jax.ShapeDtypeStruct((NUM_CLASSES, bk), jnp.float32),
        grid_spec=pl.GridSpec(
            grid=(grid_b,),
            in_specs=[
                # x: tiled along the batch, auto double-buffered per grid step.
                pl.BlockSpec((tm, INPUT_SIZE), lambda i: (i, 0)),
                # params: constant index_map -> DMA'd once, VMEM resident.
                pl.BlockSpec((INPUT_SIZE, HIDDEN_SIZE), lambda i: (0, 0)),
                pl.BlockSpec((1, HIDDEN_SIZE), lambda i: (0, 0)),
                pl.BlockSpec((_CLASSES_PAD, HIDDEN_SIZE), lambda i: (0, 0)),
                pl.BlockSpec((NUM_CLASSES, 1), lambda i: (0, 0)),
            ],
            # Lane-dense transposed output: (3, tm) block, batch on lanes.
            out_specs=pl.BlockSpec((NUM_CLASSES, tm), lambda i: (0, i)),
        ),
        compiler_params=pltpu.CompilerParams(
            dimension_semantics=("parallel",),
            vmem_limit_bytes=vmem_limit,
        ),
        cost_estimate=pl.CostEstimate(
            flops=flops, transcendentals=0, bytes_accessed=bytes_accessed),
    )(x_k, w1_k, b1_k, w2t_k, b2t_k)

    if bk != B:
        out_t = out_t[:, :B]
    if transposed_output:
        return out_t
    # Layout plumbing only (tiny, 12 B/row); consumers that can take (3, B)
    # should request transposed_output=True and skip this.
    return out_t.T


def init_params(key):
    """Deterministic init mirroring nn.Linear default (uniform +-1/sqrt(fan_in)).
    Weights stored as (in_features, out_features)."""
    k1, k2, k3, k4 = jax.random.split(key, 4)
    bound1 = 1.0 / jnp.sqrt(jnp.float32(INPUT_SIZE))
    bound2 = 1.0 / jnp.sqrt(jnp.float32(HIDDEN_SIZE))
    w1 = jax.random.uniform(k1, (INPUT_SIZE, HIDDEN_SIZE), jnp.float32,
                            -bound1, bound1)
    b1 = jax.random.uniform(k2, (1, HIDDEN_SIZE), jnp.float32, -bound1, bound1)
    w2 = jax.random.uniform(k3, (HIDDEN_SIZE, NUM_CLASSES), jnp.float32,
                            -bound2, bound2)
    b2 = jax.random.uniform(k4, (1, NUM_CLASSES), jnp.float32, -bound2, bound2)
    return w1, b1, w2, b2


if __name__ == "__main__":
    key = jax.random.PRNGKey(0)
    kp, kx = jax.random.split(key)
    w1, b1, w2, b2 = init_params(kp)

    def ref_f32(xv):          # exact f32 math (PyTorch semantics)
        return jnp.maximum(xv @ w1 + b1, 0.0) @ w2 + b2

    def ref_bf16(xv):         # same bf16-operand / f32-accumulate contraction
        h = jnp.dot(xv.astype(jnp.bfloat16), w1.astype(jnp.bfloat16),
                    preferred_element_type=jnp.float32) + b1
        h = jnp.maximum(h, 0.0)
        return jnp.dot(h.astype(jnp.bfloat16), w2.astype(jnp.bfloat16),
                       preferred_element_type=jnp.float32) + b2

    # 16: single aligned block; 5: tiny ragged (sublane pad path);
    # 2500: multi-step grid with a partial (masked) last block.
    x_last = None
    for batch in (16, 5, 2500):
        kx, k = jax.random.split(kx)
        x = jax.random.normal(k, (batch, INPUT_SIZE), jnp.float32)
        out = jax.block_until_ready(net_forward(x, w1, b1, w2, b2))
        assert out.shape == (batch, NUM_CLASSES), out.shape
        assert jnp.allclose(out, ref_bf16(x), atol=1e-2, rtol=1e-2), batch
        assert jnp.allclose(out, ref_f32(x), atol=5e-2, rtol=5e-2), batch
        x_last = x

    # Lane-dense (transposed) output path.
    out_t = jax.block_until_ready(
        net_forward(x_last, w1, b1, w2, b2, transposed_output=True))
    assert out_t.shape == (NUM_CLASSES, x_last.shape[0])
    assert jnp.allclose(out_t.T, ref_bf16(x_last), atol=1e-2, rtol=1e-2)

    print("KERNEL_OK")
</pallas_src>

<mosaic_0001>
module attributes {stable_mosaic.version = 11 : i64} {
  func.func @mlp_kernel(%arg0: i32, %arg1: memref<16x36xf32, #tpu.memory_space<vmem>>, %arg2: memref<36x72xbf16, #tpu.memory_space<vmem>>, %arg3: memref<1x72xf32, #tpu.memory_space<vmem>>, %arg4: memref<8x72xbf16, #tpu.memory_space<vmem>>, %arg5: memref<3x1xf32, #tpu.memory_space<vmem>>, %arg6: memref<3x16xf32, #tpu.memory_space<vmem>>) attributes {dimension_semantics = [#tpu.dimension_semantics<parallel>], iteration_bounds = array<i64: 1>, scalar_prefetch = 0 : i64, scratch_operands = 0 : i64, tpu.core_type = #tpu.core_type<tc>, window_params = [{transform_indices = @transform_0, window_bounds = array<i64: 16, 36>}, {pipeline_mode = #tpu.pipeline_mode<synchronous>, transform_indices = @transform_1, window_bounds = array<i64: 36, 72>}, {pipeline_mode = #tpu.pipeline_mode<synchronous>, transform_indices = @transform_2, window_bounds = array<i64: 1, 72>}, {pipeline_mode = #tpu.pipeline_mode<synchronous>, transform_indices = @transform_3, window_bounds = array<i64: 8, 72>}, {pipeline_mode = #tpu.pipeline_mode<synchronous>, transform_indices = @transform_4, window_bounds = array<i64: 3, 1>}, {transform_indices = @transform_5, window_bounds = array<i64: 3, 16>}]} {
    %c0 = arith.constant 0 : index
    %c0_0 = arith.constant 0 : index
    %0 = vector.load %arg1[%c0, %c0_0] : memref<16x36xf32, #tpu.memory_space<vmem>>, vector<16x36xf32>
    %1 = arith.truncf %0 : vector<16x36xf32> to vector<16x36xbf16>
    %c0_1 = arith.constant 0 : index
    %c0_2 = arith.constant 0 : index
    %2 = vector.load %arg2[%c0_1, %c0_2] : memref<36x72xbf16, #tpu.memory_space<vmem>>, vector<36x72xbf16>
    %cst = arith.constant dense<0.000000e+00> : vector<16x72xf32>
    %3 = tpu.matmul %1, %2, %cst {dimension_numbers = #tpu.dot_dimension_numbers<[1], [0], [0], [1], [0, 0, 1, 1], [], []>} : vector<16x36xbf16>, vector<36x72xbf16>, vector<16x72xf32> -> vector<16x72xf32>
    %c0_3 = arith.constant 0 : index
    %c0_4 = arith.constant 0 : index
    %4 = vector.load %arg3[%c0_3, %c0_4] : memref<1x72xf32, #tpu.memory_space<vmem>>, vector<1x72xf32>
    %5 = vector.broadcast %4 : vector<1x72xf32> to vector<16x72xf32>
    %6 = arith.addf %3, %5 : vector<16x72xf32>
    %cst_5 = arith.constant 0.000000e+00 : f32
    %7 = vector.broadcast %cst_5 : f32 to vector<16x72xf32>
    %8 = arith.maximumf %6, %7 : vector<16x72xf32>
    %9 = arith.truncf %8 : vector<16x72xf32> to vector<16x72xbf16>
    %c0_6 = arith.constant 0 : index
    %c0_7 = arith.constant 0 : index
    %10 = vector.load %arg4[%c0_6, %c0_7] : memref<8x72xbf16, #tpu.memory_space<vmem>>, vector<8x72xbf16>
    %cst_8 = arith.constant dense<0.000000e+00> : vector<8x16xf32>
    %11 = tpu.matmul %10, %9, %cst_8 {dimension_numbers = #tpu.dot_dimension_numbers<[1], [1], [0], [0], [0, 0, 1, 0], [], []>} : vector<8x72xbf16>, vector<16x72xbf16>, vector<8x16xf32> -> vector<8x16xf32>
    %12 = vector.extract_strided_slice %11 {offsets = [0, 0], sizes = [3, 16], strides = [1, 1]} : vector<8x16xf32> to vector<3x16xf32>
    %c0_9 = arith.constant 0 : index
    %c0_10 = arith.constant 0 : index
    %13 = vector.load %arg5[%c0_9, %c0_10] : memref<3x1xf32, #tpu.memory_space<vmem>>, vector<3x1xf32>
    %14 = vector.broadcast %13 : vector<3x1xf32> to vector<3x16xf32>
    %15 = arith.addf %12, %14 : vector<3x16xf32>
    %c0_11 = arith.constant 0 : index
    %c0_12 = arith.constant 0 : index
    %16 = vector.load %arg6[%c0_11, %c0_12] : memref<3x16xf32, #tpu.memory_space<vmem>>, vector<3x16xf32>
    tpu.vector_store %arg6[%c0_11, %c0_12], %15 {strides = array<i32>} : memref<3x16xf32, #tpu.memory_space<vmem>>, vector<3x16xf32>,
    return
  }
  func.func @transform_0(%arg0: i32) -> (i32, i32) {
    %c0_i32 = arith.constant 0 : i32
    %c0_i32_0 = arith.constant 0 : i32
    return %arg0, %c0_i32 : i32, i32
  }
  func.func @transform_1(%arg0: i32) -> (i32, i32) {
    %c0_i32 = arith.constant 0 : i32
    %c0_i32_0 = arith.constant 0 : i32
    %c0_i32_1 = arith.constant 0 : i32
    return %c0_i32, %c0_i32_0 : i32, i32
  }
  func.func @transform_2(%arg0: i32) -> (i32, i32) {
    %c0_i32 = arith.constant 0 : i32
    %c0_i32_0 = arith.constant 0 : i32
    %c0_i32_1 = arith.constant 0 : i32
    return %c0_i32, %c0_i32_0 : i32, i32
  }
  func.func @transform_3(%arg0: i32) -> (i32, i32) {
    %c0_i32 = arith.constant 0 : i32
    %c0_i32_0 = arith.constant 0 : i32
    %c0_i32_1 = arith.constant 0 : i32
    return %c0_i32, %c0_i32_0 : i32, i32
  }
  func.func @transform_4(%arg0: i32) -> (i32, i32) {
    %c0_i32 = arith.constant 0 : i32
    %c0_i32_0 = arith.constant 0 : i32
    %c0_i32_1 = arith.constant 0 : i32
    return %c0_i32, %c0_i32_0 : i32, i32
  }
  func.func @transform_5(%arg0: i32) -> (i32, i32) {
    %c0_i32 = arith.constant 0 : i32
    %c0_i32_0 = arith.constant 0 : i32
    return %c0_i32, %arg0 : i32, i32
  }
}

</mosaic_0001>

<bundles_post_ra>
// kernel: tpu_custom_call.1
= control target key start
LH: loop header
LB: loop body
LE: loop exit
PB: predicated region body
PF: predicated region fallthrough
CT: control target
= control target key end

     0   :  { %10 = vsyncpa [#allocation3], 0  ;;  %s404_s0 = inlined_call_operand.hbm [shape: f32[16,36], index: 0, kind: input, shape index: {}]   ;;  %s405_s1 = inlined_call_operand.hbm [shape: bf16[36,72], index: 1, kind: input, shape index: {}]   ;;  %s406_s2 = inlined_call_operand.vmem [shape: f32[1,72], index: 2, kind: input, shape index: {}]   ;;  %s407_s3 = inlined_call_operand.vmem [shape: bf16[8,72], index: 3, kind: input, shape index: {}]   ;;  %s408_s4 = inlined_call_operand.vmem [shape: f32[3,1], index: 4, kind: input, shape index: {}]   ;;  %s409_s5 = inlined_call_operand.hbm [shape: f32[3,16], index: 5, kind: output, shape index: {}]  }
   0x1   :  { %11 = vsyncpa [#allocation6], 0 }
   0x2   :  { %12 = vsyncpa [#allocation4], 0  ;;  %s319_s18 = smov [#allocation2]   ;;  %s247_s22 = scalar_lea.hbm %s404_s0, 256 }
   0x3   :  { %s18_s19 = sshll.u32 %s319_s18, 4  ;;  %p248_p0 = scmp.ne.s32.totalorder %s404_s0, %s247_s22  ;;  %s19_s19 = int_to_ptr.vmem [resolvable:$true] %s18_s19 }
   0x4   :  { %p251_p1 = scmp.lt.u32.totalorder %s247_s22, %s404_s0 }
   0x6   :  { %p253_p2 = pnand %p251_p1, %p248_p0 }
   0x8   :  { %256 = shalt.err (!%p253_p2)
}
   0x9   :  { %s257_s27 = scalar_lea.vmem %s19_s19, 256  ;;  %p262_p4 = scmp.lt.s32.totalorder %s19_s19, %s19_s19 }
   0xa   :  { %p258_p3 = scmp.ne.s32.totalorder %s19_s19, %s257_s27  ;;  %p263_p5 = scmp.lt.s32.totalorder %s257_s27, %s257_s27 }
   0xc   :  { %p264_p6 = por %p263_p5, %p262_p4 }
   0xe   :  { %p265_p7 = pnand %p264_p6, %p258_p3 }
  0x10   :  { %268 = shalt.err (!%p265_p7)
}
  0x11   :  { %s320_s28 = smov 128   ;;  %s321_s29 = smov 8  }
  0x12   :  { %24 = dma.hbm_to_vmem [thread:$0]  %s404_s0, 256, %s19_s19, [#allocation3], %s320_s28, %s320_s28, %s321_s29  }
  0x13   :  { %s322_s7 = smov [#allocation5]   ;;  %s269_s11 = scalar_lea.hbm %s405_s1, 320 }
  0x14   :  { %s30_s8 = sshll.u32 %s322_s7, 4  ;;  %p270_p8 = scmp.ne.s32.totalorder %s405_s1, %s269_s11  ;;  %s31_s8 = int_to_ptr.vmem [resolvable:$true] %s30_s8 }
  0x15   :  { %p273_p9 = scmp.lt.u32.totalorder %s269_s11, %s405_s1 }
  0x17   :  { %p275_p10 = pnand %p273_p9, %p270_p8 }
  0x19   :  { %278 = shalt.err (!%p275_p10)
}
  0x1a   :  { %s279_s16 = scalar_lea.vmem %s31_s8, 320  ;;  %p284_p12 = scmp.lt.s32.totalorder %s31_s8, %s31_s8 }
  0x1b   :  { %p280_p11 = scmp.ne.s32.totalorder %s31_s8, %s279_s16  ;;  %p285_p13 = scmp.lt.s32.totalorder %s279_s16, %s279_s16 }
  0x1d   :  { %p286_p0 = por %p285_p13, %p284_p12 }
  0x1f   :  { %p287_p1 = pnand %p286_p0, %p280_p11 }
  0x21   :  { %290 = shalt.err (!%p287_p1)
}
  0x22   :  { %s323_s0 = smov 64   ;;  %s324_s17 = smov 4  }
  0x23   :  { %36 = dma.hbm_to_vmem [thread:$0]  %s405_s1, 320, %s31_s8, [#allocation6], %s323_s0, %s323_s0, %s324_s17  }
  0x24   :  { %313 = dma.done.wait [#allocation3], 256  }
  0x25   :  { %314 = vsyncadd [#allocation3], 4294967040 }
  0x26   :  { %315 = dma.done.wait [#allocation6], 320  }
  0x27   :  { %316 = vsyncadd [#allocation6], 4294966976  ;;  %v325_v0 = vmov 0.0   ;;  %vm326_vm0 = vmmov 0   ;;  %v244_v1 = vld [vmem:[#allocation5] sm:$0xff]   ;;  %v245_v2 = vld [vmem:[#allocation5 + $0x8] sm:$0xff]  }
  0x28   :  { %217 = vmatprep.subr.bf16.mxu0 %v325_v0  ;;  %223 = vmatprep.mubr.msk.bf16.mxu0 %vm326_vm0, %v325_v0  ;;  %v246_v3 = vld [vmem:[#allocation5 + $0x10] ss:$0 sps:$4 sm:$0x33]   ;;  %vm84_vm1 = vcmask 1041408   ;;  %v51_v5 = vld [vmem:[#allocation2 + $0x8] sm:$0xff]  ;;  %vm80_vm2 = vcmask 293888  }
  0x29   :  { %227 = vmatprep.subr.bf16.mxu1 %v325_v0  ;;  %229 = vmatprep.mubr.msk.bf16.mxu1 %vm326_vm0, %v325_v0  ;;  %v50_v4 = vld [vmem:[#allocation2] sm:$0xff]  ;;  %v86_v6 = vsel %vm84_vm1, %v246_v3, 0  ;;  %v327_v9 = vmov 0   ;;  %vm133_vm3 = vcmask 588800   ;;  %s328_s24 = smov [#allocation7]   ;;  %vm187_vm4 = vcmask 124928  }
  0x2a   :  { %218 = vmatpush3.bf16.msra.mxu0 %v244_v1  ;;  %v52_v7 = vpack.c.bf16 %v51_v5, %v50_v4  ;;  %v180_v8 = vld [vmem:[%s408_s4] sm:$0x7]  ;;  %243 = vset.pattern.permute.xlu0 %v327_v9 }
  0x2b   :  { %219 = vmatprep.subr.bf16.mxu0 %v325_v0  ;;  %183 = vperm.xlu0 %243, %v180_v8   ;;  %v205_v10 = vld [vmem:[%s406_s2] ss:$0 sm:$0xff]  ;;  %s195_s2 = sshll.u32 %s328_s24, 4  ;;  %s196_s2 = int_to_ptr.vmem [resolvable:$true] %s195_s2 }
  0x2c   :  { %v132_v21 = vld [vmem:[%s407_s3] sm:$0xf]  ;;  %s291_s25 = scalar_lea.vmem %s196_s2, 64  ;;  %p296_p3 = scmp.lt.s32.totalorder %s196_s2, %s196_s2 }
  0x2d   :  { %p292_p2 = scmp.ne.s32.totalorder %s196_s2, %s291_s25  ;;  %p297_p4 = scmp.lt.s32.totalorder %s291_s25, %s291_s25 }
  0x2e   :  { %220 = vmatpush3.bf16.msra.mxu0 %v245_v2 }
  0x2f   :  { %221 = vmatprep.subr.bf16.mxu0 %v325_v0  ;;  %p298_p5 = por %p297_p4, %p296_p3 }
  0x31   :  { %p299_p6 = pnand %p298_p5, %p292_p2 }
  0x32   :  { %222 = vmatpush3.bf16.msra.mxu0 %v86_v6 }
  0x35   :  { %224 = vmatmul.mubr.msk.bf16.vlgmr.msra.gmra.mrb[0].mxu0 %vm80_vm2, %v52_v7 }
  0xaa   :  { %v184_v22 = vpop.permute.xlu0 %183 }
 0x108   :  { %v122_v11 = vpop.f32.mrb[0].mxu0 }
 0x109   :  { %v123_v12 = vadd.f32 %v205_v10, %v122_v11  ;;  %v225_v13 = vpop.f32.mrb[1].mxu0 }
 0x10a   :  { %v125_v14 = vpop.f32.mrb[2].mxu0 }
 0x10b   :  { %v126_v15 = vadd.f32 %v205_v10, %v125_v14  ;;  %v226_v16 = vpop.f32.mrb[3].mxu0  ;;  %v129_v17 = vmax.f32 %v123_v12, 0.0 }
 0x10d   :  { %v130_v18 = vmax.f32 %v126_v15, 0.0 }
 0x10f   :  { %v131_v19 = vpack.c.bf16 %v130_v18, %v129_v17 }
 0x111   :  { %v138_v20 = vsel %vm133_vm3, %v131_v19, 0 }
 0x112   :  { %228 = vmatpush3.bf16.xpose.msra.mxu1 %v138_v20 }
 0x119   :  { %230 = vmatmul.mubr.msk.bf16.vlgmr.msra.gmra.mrb[0].mxu1 %vm133_vm3, %v132_v21 }
 0x1ec   :  { %v174_v23 = vpop.f32.mrb[0].mxu1 }
 0x1ed   :  { %v186_v24 = vadd.f32 %v184_v22, %v174_v23  ;;  %v231_v25 = vpop.f32.mrb[1].mxu1 }
 0x1ee   :  { %v177_v26 = vpop.f32.mrb[2].mxu1 }
 0x1ef   :  { %v232_v27 = vpop.f32.mrb[3].mxu1  ;;  %188 = vst.msk [vmem:[#allocation7] sm:$0x7] %vm187_vm4, %v186_v24 }
 0x1f0   :  { %302 = shalt.err (!%p299_p6)
}
 0x1f1   :  { %s303_s27 = scalar_lea.hbm %s409_s5, 64 }
 0x1f2   :  { %p304_p7 = scmp.ne.s32.totalorder %s409_s5, %s303_s27  ;;  %p307_p8 = scmp.lt.u32.totalorder %s303_s27, %s409_s5 }
 0x1f4   :  { %p309_p9 = pnand %p307_p8, %p304_p7 }
 0x1f6   :  { %312 = shalt.err (!%p309_p9)
}
 0x1f7   :  { %198 = dma.vmem_to_hbm [thread:$0]  %s196_s2, 64, %s409_s5, [#allocation4]  }
 0x1f8   :  { %317 = dma.done.wait [#allocation4], 64  }
 0x1f9   :  { %318 = vsyncadd [#allocation4], 4294967232 }
 0x1fa   :  { %202 = vsyncpa [#allocation3], 1 }
 0x1fb   :  { %203 = vsyncpa [#allocation6], 1 }
 0x1fc   :  { %204 = vsyncpa [#allocation4], 1 }

</bundles_post_ra>
